<compile_context>
chip_gen: v7x
topology: tpu7x:2x2x1
jax: 0.10.0
libtpu: 0.0.40
codegen_flags: <defaults>
</compile_context>

<pallas_src>
import functools
import math

import jax
import jax.numpy as jnp
from jax.experimental import pallas as pl
from jax.experimental.pallas import tpu as pltpu


def _mdn_packed_kernel(x_ref, w_ref, b_ref, pi_ref, sigma_ref, mu_ref, *, rG):
    # One fused MXU GEMM over the lane-packed block-diagonal weight,
    # f32 accumulation, fused bias broadcast (sigma bias is zero).
    fused = jnp.dot(x_ref[...], w_ref[...],
                    preferred_element_type=jnp.float32) + b_ref[...]

    # Each head is its own lane slab of rG lanes (rG == 128 when G | 128), so the
    # three stores are lane-dense and exp() only touches the sigma slab.
    pi_ref[...] = fused[:, :rG].astype(pi_ref.dtype)
    s = fused[:, rG:2 * rG]
    # ELU(s) + 1 + 1e-15 with the constants folded into each select branch.
    sigma_ref[...] = jnp.where(s > 0.0,
                               s + (1.0 + 1e-15),
                               jnp.exp(s) + 1e-15).astype(sigma_ref.dtype)
    mu_ref[...] = fused[:, 2 * rG:].astype(mu_ref.dtype)


def mixture_density_head(x, w_pi, b_pi, w_sigma, w_mu, b_mu, *,
                         compute_dtype=jnp.bfloat16,
                         target_rows_per_step=32768):
    """x: (B, D); weights stored transposed vs. nn.Linear, i.e. (D, G); biases (1, G)."""
    B, D = x.shape
    G = w_pi.shape[1]
    out_dtype = jnp.float32

    # Lane-packing factor: pack r batch rows per "wide" row so each head spans
    # r*G (=128) lanes. Fall back to r=1 (plain fused head) if G does not divide
    # 128 or the packed feature dim would get unreasonably wide.
    if 128 % G == 0 and D * (128 // G) <= 8192:
        r = 128 // G
    else:
        r = 1
    rG, rD = r * G, r * D

    # Pad the batch to a multiple of r (zeros; stripped at the end).
    B_pad = r * pl.cdiv(B, r)
    if B_pad != B:
        x = jnp.pad(x, ((0, B_pad - B), (0, 0)))
    Bp = B_pad // r

    # Packed x: free contiguous reinterpretation (Bp, r*D); bf16 halves HBM read.
    xp = x.reshape(Bp, rD).astype(compute_dtype)

    # Block-diagonal fused weight (r*D, 3*r*G): for packed sub-row j and head h,
    # rows [j*D, (j+1)*D) x cols [h*rG + j*G, h*rG + (j+1)*G) hold W_head.
    # The zero blocks only cost MXU FLOPs, and the kernel is HBM-bound.
    w_heads = jnp.stack([w_pi, w_sigma, w_mu], axis=0)            # (3, D, G)
    eye_r = jnp.eye(r, dtype=jnp.float32)                         # (r, r)
    wp = jnp.einsum('jk,hdg->jdhkg', eye_r, w_heads).reshape(rD, 3 * rG)
    wp = wp.astype(compute_dtype)

    # Fused bias (1, 3*r*G); sigma has no bias (sigma_bias_flag = False).
    bp = jnp.concatenate([jnp.tile(b_pi, (1, r)),
                          jnp.zeros((1, rG), jnp.float32),
                          jnp.tile(b_mu, (1, r))], axis=1).astype(jnp.float32)

    # Batch tiling over packed rows: ~32768 original rows per step; if the whole
    # batch fits in one target tile, still use >= 2 steps so the "parallel" grid
    # axis can be sharded across both TensorCores on v7x.
    tbp_target = max(8, (max(target_rows_per_step, r) // r // 8) * 8)
    if Bp > tbp_target:
        tbp = tbp_target
    elif Bp >= 16:
        tbp = 8 * pl.cdiv(pl.cdiv(Bp, 2), 8)
    else:
        tbp = Bp                                   # single full-extent block
    grid = (pl.cdiv(Bp, tbp),)

    pi_p, sigma_p, mu_p = pl.pallas_call(
        functools.partial(_mdn_packed_kernel, rG=rG),
        out_shape=(jax.ShapeDtypeStruct((Bp, rG), out_dtype),
                   jax.ShapeDtypeStruct((Bp, rG), out_dtype),
                   jax.ShapeDtypeStruct((Bp, rG), out_dtype)),
        grid_spec=pltpu.PrefetchScalarGridSpec(
            num_scalar_prefetch=0,
            grid=grid,
            in_specs=[
                pl.BlockSpec((tbp, rD), lambda i: (i, 0)),      # x: batch-tiled
                pl.BlockSpec((rD, 3 * rG), lambda i: (0, 0)),   # fused W: resident
                pl.BlockSpec((1, 3 * rG), lambda i: (0, 0)),    # fused bias: resident
            ],
            out_specs=[
                pl.BlockSpec((tbp, rG), lambda i: (i, 0)),      # pi
                pl.BlockSpec((tbp, rG), lambda i: (i, 0)),      # sigma
                pl.BlockSpec((tbp, rG), lambda i: (i, 0)),      # mu
            ],
        ),
        compiler_params=pltpu.CompilerParams(
            dimension_semantics=("parallel",),       # shard batch across TCs on v7x
            vmem_limit_bytes=32 * 1024 * 1024,       # headroom above v5e's 16 MiB default
        ),
    )(xp, wp, bp)

    # Un-pack each head: (Bp, r*G) -> (B_pad, G) is a free reshape; strip padding.
    pi = pi_p.reshape(B_pad, G)[:B]
    sigma = sigma_p.reshape(B_pad, G)[:B]
    mu = mu_p.reshape(B_pad, G)[:B]
    return pi, sigma, mu


def reference(x, w_pi, b_pi, w_sigma, w_mu, b_mu, compute_dtype=jnp.float32):
    """Pure-JAX reference (PyTorch forward semantics), with inputs quantized to
    the kernel's MXU input dtype so the comparison isolates kernel structure."""
    hp = jax.lax.Precision.HIGHEST
    xq = x.astype(compute_dtype).astype(jnp.float32)
    wpq = w_pi.astype(compute_dtype).astype(jnp.float32)
    wsq = w_sigma.astype(compute_dtype).astype(jnp.float32)
    wmq = w_mu.astype(compute_dtype).astype(jnp.float32)
    pi = jnp.dot(xq, wpq, precision=hp) + b_pi
    s = jnp.dot(xq, wsq, precision=hp)
    sigma = jnp.where(s > 0, s, jnp.exp(s) - 1.0) + 1.0 + 1e-15     # ELU(s) + 1 + 1e-15
    mu = jnp.dot(xq, wmq, precision=hp) + b_mu
    return pi, sigma, mu


def _make_params(key, D, G):
    kpi_w, kpi_b, ksig_w, kmu_w = jax.random.split(key, 4)
    bound = 1.0 / math.sqrt(D)
    # nn.init.normal_ for pi.weight / mu.weight; Linear-default-ish for the rest.
    w_pi = jax.random.normal(kpi_w, (D, G), dtype=jnp.float32)
    b_pi = jax.random.uniform(kpi_b, (1, G), dtype=jnp.float32,
                              minval=-bound, maxval=bound)
    w_sigma = jax.random.uniform(ksig_w, (D, G), dtype=jnp.float32,
                                 minval=-bound, maxval=bound)
    w_mu = jax.random.normal(kmu_w, (D, G), dtype=jnp.float32)
    b_mu = jnp.arange(G, dtype=jnp.float32)[None, :]     # mu_bias_init = [0,1,2,3]
    return w_pi, b_pi, w_sigma, w_mu, b_mu


if __name__ == "__main__":
    # hparams: input_dim=32, num_gaussian=4, sigma_bias_flag=False,
    #          mu_bias_init=[0.0, 1.0, 2.0, 3.0]
    D, G = 32, 4
    key = jax.random.PRNGKey(0)
    kparams, kx0, kx1, kx2 = jax.random.split(key, 4)
    params = _make_params(kparams, D, G)
    xkeys = {64: kx0, 1000: kx1, 200: kx2}

    cases = [
        # (batch, MXU input dtype)   -- covers: single-step grid, padded batch +
        #                               2-step "parallel" grid, and the f32 path.
        (64, jnp.bfloat16),
        (1000, jnp.bfloat16),
        (200, jnp.float32),
    ]
    for B, cdt in cases:
        x = jax.random.normal(xkeys[B], (B, D), dtype=jnp.float32)
        fwd = jax.jit(functools.partial(mixture_density_head, compute_dtype=cdt))
        outs = fwd(x, *params)
        jax.block_until_ready(outs)
        refs = reference(x, *params, compute_dtype=cdt)
        for got, want, name in zip(outs, refs, ("pi", "sigma", "mu")):
            assert got.shape == (B, G), f"{name} shape {got.shape} != {(B, G)}"
            err = float(jnp.max(jnp.abs(got - want)))
            assert jnp.allclose(got, want, atol=1e-3, rtol=1e-3), (
                f"{name} mismatch: B={B} dtype={cdt} max_abs_err={err}")
        assert bool(jnp.all(outs[1] > 0.0)), "sigma must be strictly positive"

    # TODO(synk): gaussian_probability / log_prob / sample / generate_* are not
    # part of forward() and are not implemented as kernels.
    print("KERNEL_OK")
</pallas_src>

<mosaic_0001>
module attributes {stable_mosaic.version = 11 : i64} {
  func.func @_mdn_packed_kernel(%arg0: i32, %arg1: memref<2x1024xbf16, #tpu.memory_space<vmem>>, %arg2: memref<1024x384xbf16, #tpu.memory_space<vmem>>, %arg3: memref<1x384xf32, #tpu.memory_space<vmem>>, %arg4: memref<2x128xf32, #tpu.memory_space<vmem>>, %arg5: memref<2x128xf32, #tpu.memory_space<vmem>>, %arg6: memref<2x128xf32, #tpu.memory_space<vmem>>) attributes {dimension_semantics = [#tpu.dimension_semantics<parallel>], iteration_bounds = array<i64: 1>, scalar_prefetch = 0 : i64, scratch_operands = 0 : i64, tpu.core_type = #tpu.core_type<tc>, window_params = [{transform_indices = @transform_0, window_bounds = array<i64: 2, 1024>}, {pipeline_mode = #tpu.pipeline_mode<synchronous>, transform_indices = @transform_1, window_bounds = array<i64: 1024, 384>}, {pipeline_mode = #tpu.pipeline_mode<synchronous>, transform_indices = @transform_2, window_bounds = array<i64: 1, 384>}, {transform_indices = @transform_3, window_bounds = array<i64: 2, 128>}, {transform_indices = @transform_4, window_bounds = array<i64: 2, 128>}, {transform_indices = @transform_5, window_bounds = array<i64: 2, 128>}]} {
    %c0 = arith.constant 0 : index
    %c0_0 = arith.constant 0 : index
    %0 = vector.load %arg1[%c0, %c0_0] : memref<2x1024xbf16, #tpu.memory_space<vmem>>, vector<2x1024xbf16>
    %c0_1 = arith.constant 0 : index
    %c0_2 = arith.constant 0 : index
    %1 = vector.load %arg2[%c0_1, %c0_2] : memref<1024x384xbf16, #tpu.memory_space<vmem>>, vector<1024x384xbf16>
    %cst = arith.constant dense<0.000000e+00> : vector<2x384xf32>
    %2 = tpu.matmul %0, %1, %cst {dimension_numbers = #tpu.dot_dimension_numbers<[1], [0], [0], [1], [0, 0, 1, 1], [], []>} : vector<2x1024xbf16>, vector<1024x384xbf16>, vector<2x384xf32> -> vector<2x384xf32>
    %c0_3 = arith.constant 0 : index
    %c0_4 = arith.constant 0 : index
    %3 = vector.load %arg3[%c0_3, %c0_4] : memref<1x384xf32, #tpu.memory_space<vmem>>, vector<1x384xf32>
    %4 = vector.broadcast %3 : vector<1x384xf32> to vector<2x384xf32>
    %5 = arith.addf %2, %4 : vector<2x384xf32>
    %6 = vector.extract_strided_slice %5 {offsets = [0, 0], sizes = [2, 128], strides = [1, 1]} : vector<2x384xf32> to vector<2x128xf32>
    %c0_5 = arith.constant 0 : index
    %c0_6 = arith.constant 0 : index
    %7 = vector.load %arg4[%c0_5, %c0_6] : memref<2x128xf32, #tpu.memory_space<vmem>>, vector<2x128xf32>
    tpu.vector_store %arg4[%c0_5, %c0_6], %6 {strides = array<i32>} : memref<2x128xf32, #tpu.memory_space<vmem>>, vector<2x128xf32>,
    %8 = vector.extract_strided_slice %5 {offsets = [0, 128], sizes = [2, 128], strides = [1, 1]} : vector<2x384xf32> to vector<2x128xf32>
    %cst_7 = arith.constant 0.000000e+00 : f32
    %9 = vector.broadcast %cst_7 : f32 to vector<2x128xf32>
    %10 = arith.cmpf ogt, %8, %9 : vector<2x128xf32>
    %cst_8 = arith.constant 1.000000e+00 : f32
    %11 = vector.broadcast %cst_8 : f32 to vector<2x128xf32>
    %12 = arith.addf %8, %11 : vector<2x128xf32>
    %13 = math.exp %8 : vector<2x128xf32>
    %cst_9 = arith.constant 1.000000e-15 : f32
    %14 = vector.broadcast %cst_9 : f32 to vector<2x128xf32>
    %15 = arith.addf %13, %14 : vector<2x128xf32>
    %16 = arith.select %10, %12, %15 : vector<2x128xi1>, vector<2x128xf32>
    %c0_10 = arith.constant 0 : index
    %c0_11 = arith.constant 0 : index
    %17 = vector.load %arg5[%c0_10, %c0_11] : memref<2x128xf32, #tpu.memory_space<vmem>>, vector<2x128xf32>
    tpu.vector_store %arg5[%c0_10, %c0_11], %16 {strides = array<i32>} : memref<2x128xf32, #tpu.memory_space<vmem>>, vector<2x128xf32>,
    %18 = vector.extract_strided_slice %5 {offsets = [0, 256], sizes = [2, 128], strides = [1, 1]} : vector<2x384xf32> to vector<2x128xf32>
    %c0_12 = arith.constant 0 : index
    %c0_13 = arith.constant 0 : index
    %19 = vector.load %arg6[%c0_12, %c0_13] : memref<2x128xf32, #tpu.memory_space<vmem>>, vector<2x128xf32>
    tpu.vector_store %arg6[%c0_12, %c0_13], %18 {strides = array<i32>} : memref<2x128xf32, #tpu.memory_space<vmem>>, vector<2x128xf32>,
    return
  }
  func.func @transform_0(%arg0: i32) -> (i32, i32) {
    %c0_i32 = arith.constant 0 : i32
    %c0_i32_0 = arith.constant 0 : i32
    return %arg0, %c0_i32 : i32, i32
  }
  func.func @transform_1(%arg0: i32) -> (i32, i32) {
    %c0_i32 = arith.constant 0 : i32
    %c0_i32_0 = arith.constant 0 : i32
    %c0_i32_1 = arith.constant 0 : i32
    return %c0_i32, %c0_i32_0 : i32, i32
  }
  func.func @transform_2(%arg0: i32) -> (i32, i32) {
    %c0_i32 = arith.constant 0 : i32
    %c0_i32_0 = arith.constant 0 : i32
    %c0_i32_1 = arith.constant 0 : i32
    return %c0_i32, %c0_i32_0 : i32, i32
  }
  func.func @transform_3(%arg0: i32) -> (i32, i32) {
    %c0_i32 = arith.constant 0 : i32
    %c0_i32_0 = arith.constant 0 : i32
    return %arg0, %c0_i32 : i32, i32
  }
  func.func @transform_4(%arg0: i32) -> (i32, i32) {
    %c0_i32 = arith.constant 0 : i32
    %c0_i32_0 = arith.constant 0 : i32
    return %arg0, %c0_i32 : i32, i32
  }
  func.func @transform_5(%arg0: i32) -> (i32, i32) {
    %c0_i32 = arith.constant 0 : i32
    %c0_i32_0 = arith.constant 0 : i32
    return %arg0, %c0_i32 : i32, i32
  }
}

</mosaic_0001>

<bundles_post_ra>
// kernel: mixture_density_head.1
= control target key start
LH: loop header
LB: loop body
LE: loop exit
PB: predicated region body
PF: predicated region fallthrough
CT: control target
= control target key end

     0   :  { %v277_v36 = vlaneseq  ;;  %v2271_v37 = vmov 1966171168   ;;  %s2937_s1 = inlined_call_operand.vmem [shape: bf16[1024,384], index: 1, kind: input, shape index: {}]   ;;  %s2938_s0 = inlined_call_operand.vmem [shape: bf16[2,1024], index: 0, kind: input, shape index: {}]   ;;  %s2939_s2 = inlined_call_operand.vmem [shape: f32[1,384], index: 2, kind: input, shape index: {}]   ;;  %s2940_s3 = inlined_call_operand.vmem [shape: f32[2,128], index: 3, kind: output, shape index: {0}]   ;;  %s2941_s5 = inlined_call_operand.vmem [shape: f32[2,128], index: 5, kind: output, shape index: {2}]   ;;  %s2942_s4 = inlined_call_operand.vmem [shape: f32[2,128], index: 4, kind: output, shape index: {1}]  }
   0x1   :  { %v2012_v0 = vld [vmem:[%s2937_s1 + $0x4] ss:$12 sps:$4 sm:$0xff]   ;;  %v2016_v2 = vld [vmem:[%s2937_s1] ss:$12 sps:$4 sm:$0xff]   ;;  %v2018_v4 = vld [vmem:[%s2937_s1 + $0x1c] ss:$12 sps:$4 sm:$0xff]   ;;  %v295_v38 = vunpack.c.l.s4 %v2271_v37 }
   0x2   :  { %v2014_v1 = vld [vmem:[%s2937_s1 + $0x184] ss:$12 sps:$4 sm:$0xff]   ;;  %1374 = vmatprep.subr.bf16.mxu1 %v2012_v0  ;;  %v2017_v3 = vld [vmem:[%s2937_s1 + $0x180] ss:$12 sps:$4 sm:$0xff]   ;;  %v2020_v5 = vld [vmem:[%s2937_s1 + $0x19c] ss:$12 sps:$4 sm:$0xff]  }
   0x3   :  { %1415 = vmatprep.subr.bf16.mxu0 %v2014_v1  ;;  %1375 = vmatpush1.bf16.msra.mxu1 %v2016_v2  ;;  %v2022_v6 = vld [vmem:[%s2937_s1 + $0x18] ss:$12 sps:$4 sm:$0xff]   ;;  %v2024_v8 = vld [vmem:[%s2937_s1 + $0x34] ss:$12 sps:$4 sm:$0xff]   ;;  %v2028_v10 = vld [vmem:[%s2937_s1 + $0x30] ss:$12 sps:$4 sm:$0xff]   ;;  %v296_v43 = vunpack.c.0.s8 %v295_v38 }
   0x4   :  { %1416 = vmatpush1.bf16.msra.mxu0 %v2017_v3  ;;  %1376 = vmatprep.subr.bf16.mxu1 %v2018_v4  ;;  %v2023_v7 = vld [vmem:[%s2937_s1 + $0x198] ss:$12 sps:$4 sm:$0xff]   ;;  %v2026_v9 = vld [vmem:[%s2937_s1 + $0x1b4] ss:$12 sps:$4 sm:$0xff]   ;;  %v2029_v11 = vld [vmem:[%s2937_s1 + $0x1b0] ss:$12 sps:$4 sm:$0xff]  }
   0x5   :  { %1417 = vmatprep.subr.bf16.mxu0 %v2020_v5  ;;  %v2030_v12 = vld [vmem:[%s2937_s1 + $0x4c] ss:$12 sps:$4 sm:$0xff]   ;;  %v2034_v14 = vld [vmem:[%s2937_s1 + $0x48] ss:$12 sps:$4 sm:$0xff]   ;;  %v2036_v16 = vld [vmem:[%s2937_s1 + $0x64] ss:$12 sps:$4 sm:$0xff]  }
   0x6   :  { %v2032_v13 = vld [vmem:[%s2937_s1 + $0x1cc] ss:$12 sps:$4 sm:$0xff]   ;;  %v2035_v15 = vld [vmem:[%s2937_s1 + $0x1c8] ss:$12 sps:$4 sm:$0xff]   ;;  %v2038_v17 = vld [vmem:[%s2937_s1 + $0x1e4] ss:$12 sps:$4 sm:$0xff]  }
   0x7   :  { %1377 = vmatpush1.bf16.msra.mxu1 %v2022_v6  ;;  %v2040_v18 = vld [vmem:[%s2937_s1 + $0x60] ss:$12 sps:$4 sm:$0xff]   ;;  %v2042_v20 = vld [vmem:[%s2937_s1 + $0x7c] ss:$12 sps:$4 sm:$0xff]   ;;  %v2046_v22 = vld [vmem:[%s2937_s1 + $0x78] ss:$12 sps:$4 sm:$0xff]  }
   0x8   :  { %1418 = vmatpush1.bf16.msra.mxu0 %v2023_v7  ;;  %1378 = vmatprep.subr.bf16.mxu1 %v2024_v8  ;;  %v2041_v19 = vld [vmem:[%s2937_s1 + $0x1e0] ss:$12 sps:$4 sm:$0xff]   ;;  %v2044_v21 = vld [vmem:[%s2937_s1 + $0x1fc] ss:$12 sps:$4 sm:$0xff]   ;;  %v2047_v23 = vld [vmem:[%s2937_s1 + $0x1f8] ss:$12 sps:$4 sm:$0xff]  }
   0x9   :  { %1419 = vmatprep.subr.bf16.mxu0 %v2026_v9  ;;  %v2048_v24 = vld [vmem:[%s2937_s1 + $0x94] ss:$12 sps:$4 sm:$0xff]   ;;  %v2052_v26 = vld [vmem:[%s2937_s1 + $0x90] ss:$12 sps:$4 sm:$0xff]   ;;  %v2054_v28 = vld [vmem:[%s2937_s1 + $0xac] ss:$12 sps:$4 sm:$0xff]  }
   0xa   :  { %v2050_v25 = vld [vmem:[%s2937_s1 + $0x214] ss:$12 sps:$4 sm:$0xff]   ;;  %v2053_v27 = vld [vmem:[%s2937_s1 + $0x210] ss:$12 sps:$4 sm:$0xff]   ;;  %v2056_v29 = vld [vmem:[%s2937_s1 + $0x22c] ss:$12 sps:$4 sm:$0xff]  }
   0xb   :  { %1379 = vmatpush1.bf16.msra.mxu1 %v2028_v10  ;;  %v2058_v30 = vld [vmem:[%s2937_s1 + $0xa8] ss:$12 sps:$4 sm:$0xff]   ;;  %v2060_v32 = vld [vmem:[%s2937_s1 + $0xc4] ss:$12 sps:$4 sm:$0xff]   ;;  %v2064_v34 = vld [vmem:[%s2937_s1 + $0xc0] ss:$12 sps:$4 sm:$0xff]  }
   0xc   :  { %1420 = vmatpush1.bf16.msra.mxu0 %v2029_v11  ;;  %1380 = vmatprep.subr.bf16.mxu1 %v2030_v12  ;;  %v2059_v31 = vld [vmem:[%s2937_s1 + $0x228] ss:$12 sps:$4 sm:$0xff]   ;;  %v2062_v33 = vld [vmem:[%s2937_s1 + $0x244] ss:$12 sps:$4 sm:$0xff]   ;;  %v2065_v35 = vld [vmem:[%s2937_s1 + $0x240] ss:$12 sps:$4 sm:$0xff]  }
   0xd   :  { %1421 = vmatprep.subr.bf16.mxu0 %v2032_v13  ;;  %v2066_v39 = vld [vmem:[%s2937_s1 + $0xdc] ss:$12 sps:$4 sm:$0xff]   ;;  %v2070_v41 = vld [vmem:[%s2937_s1 + $0xd8] ss:$12 sps:$4 sm:$0xff]   ;;  %v2419_v42 = vshrl.u32 %v277_v36, 7 }
   0xe   :  { %v2068_v40 = vld [vmem:[%s2937_s1 + $0x25c] ss:$12 sps:$4 sm:$0xff]   ;;  %v2071_v44 = vld [vmem:[%s2937_s1 + $0x258] ss:$12 sps:$4 sm:$0xff]   ;;  %v2072_v45 = vld [vmem:[%s2937_s1 + $0xf4] ss:$12 sps:$4 sm:$0xff]  }
   0xf   :  { %1381 = vmatpush1.bf16.msra.mxu1 %v2034_v14  ;;  %v2074_v46 = vld [vmem:[%s2937_s1 + $0x274] ss:$12 sps:$4 sm:$0xff]   ;;  %v2076_v47 = vld [vmem:[%s2937_s1 + $0xf0] ss:$12 sps:$4 sm:$0xff]   ;;  %v2437_v49 = vsub.s32 %v296_v43, %v2419_v42  ;;  %v2078_v50 = vld [vmem:[%s2937_s1 + $0x10c] ss:$12 sps:$4 sm:$0xff]  }
  0x10   :  { %1422 = vmatpush1.bf16.msra.mxu0 %v2035_v15  ;;  %1382 = vmatprep.subr.bf16.mxu1 %v2036_v16  ;;  %v2077_v48 = vld [vmem:[%s2937_s1 + $0x270] ss:$12 sps:$4 sm:$0xff]   ;;  %v2080_v51 = vld [vmem:[%s2937_s1 + $0x28c] ss:$12 sps:$4 sm:$0xff]   ;;  %v2082_v52 = vld [vmem:[%s2937_s1 + $0x108] ss:$12 sps:$4 sm:$0xff]  }
  0x11   :  { %1423 = vmatprep.subr.bf16.mxu0 %v2038_v17  ;;  %v18_v53 = vld [vmem:[%s2938_s0] sm:$0xff]  ;;  %v2083_v54 = vld [vmem:[%s2937_s1 + $0x288] ss:$12 sps:$4 sm:$0xff]   ;;  %v2100_v8 = vld [vmem:[%s2937_s1 + $0x150] ss:$12 sps:$4 sm:$0xff]  }
  0x12   :  { %v300_v55 = vrot.slane %v18_v53, %v2437_v49  ;;  %v293_v56 = vcombine.high %v18_v53, %v18_v53  ;;  %v2084_v57 = vld [vmem:[%s2937_s1 + $0x124] ss:$12 sps:$4 sm:$0xff]   ;;  %v2088_v61 = vld [vmem:[%s2937_s1 + $0x120] ss:$12 sps:$4 sm:$0xff]   ;;  %v2090_v1 = vld [vmem:[%s2937_s1 + $0x13c] ss:$12 sps:$4 sm:$0xff]  }
  0x13   :  { %1383 = vmatpush1.bf16.msra.mxu1 %v2040_v18  ;;  %v2086_v58 = vld [vmem:[%s2937_s1 + $0x2a4] ss:$12 sps:$4 sm:$0xff]   ;;  %v2089_v62 = vld [vmem:[%s2937_s1 + $0x2a0] ss:$12 sps:$4 sm:$0xff]   ;;  %v2092_v2 = vld [vmem:[%s2937_s1 + $0x2bc] ss:$12 sps:$4 sm:$0xff]  }
  0x14   :  { %1424 = vmatpush1.bf16.msra.mxu0 %v2041_v19  ;;  %1384 = vmatprep.subr.bf16.mxu1 %v2042_v20  ;;  %v308_v59 = vcombine.high %v300_v55, %v300_v55  ;;  %v307_v60 = vrot.slane %v293_v56, %v2437_v49  ;;  %v2094_v4 = vld [vmem:[%s2937_s1 + $0x138] ss:$12 sps:$4 sm:$0xff]   ;;  %v2096_v6 = vld [vmem:[%s2937_s1 + $0x154] ss:$12 sps:$4 sm:$0xff]   ;;  %v2101_v9 = vld [vmem:[%s2937_s1 + $0x2d0] ss:$12 sps:$4 sm:$0xff]   ;;  %v2509_v13 = vrot.slane %v300_v55, %v2437_v49 }
  0x15   :  { %1425 = vmatprep.subr.bf16.mxu0 %v2044_v21  ;;  %v2095_v5 = vld [vmem:[%s2937_s1 + $0x2b8] ss:$12 sps:$4 sm:$0xff]   ;;  %v2098_v7 = vld [vmem:[%s2937_s1 + $0x2d4] ss:$12 sps:$4 sm:$0xff]   ;;  %v2115_v21 = vld [vmem:[%s2937_s1 + $0x31c] ss:$12 sps:$4 sm:$0xff]  }
  0x16   :  { %v330_v63 = vrot.slane %v308_v59, %v2437_v49  ;;  %v2470_v0 = vrot.slane %v307_v60, %v2437_v49  ;;  %v2102_v10 = vld [vmem:[%s2937_s1 + $0x16c] ss:$12 sps:$4 sm:$0xff]   ;;  %v2106_v12 = vld [vmem:[%s2937_s1 + $0x168] ss:$12 sps:$4 sm:$0xff]   ;;  %v2110_v15 = vld [vmem:[%s2937_s1 + $0x304] ss:$12 sps:$4 sm:$0xff]   ;;  %v309_v18 = vcombine.high %v307_v60, %v307_v60  ;;  %v2525_v19 = vcombine.high %v2509_v13, %v2509_v13 }
  0x17   :  { %1385 = vmatpush1.bf16.msra.mxu1 %v2046_v22  ;;  %v2104_v11 = vld [vmem:[%s2937_s1 + $0x2ec] ss:$12 sps:$4 sm:$0xff]   ;;  %v2107_v14 = vld [vmem:[%s2937_s1 + $0x2e8] ss:$12 sps:$4 sm:$0xff]  }
  0x18   :  { %1426 = vmatpush1.bf16.msra.mxu0 %v2047_v23  ;;  %1386 = vmatprep.subr.bf16.mxu1 %v2048_v24  ;;  %v2478_v3 = vcombine.high %v330_v63, %v330_v63  ;;  %v2111_v16 = vld [vmem:[%s2937_s1 + $0xc8] ss:$12 sps:$4 sm:$0xff]   ;;  %v2108_v17 = vld [vmem:[%s2937_s1 + $0x300] ss:$12 sps:$4 sm:$0xff]   ;;  %v2537_v23 = vrot.slane %v309_v18, %v2437_v49  ;;  %v2113_v24 = vld [vmem:[%s2937_s1 + $0x318] ss:$12 sps:$4 sm:$0xff]  }
  0x19   :  { %1427 = vmatprep.subr.bf16.mxu0 %v2050_v25  ;;  %1406 = vmatprep.mubr.bf16.mxu1 %v330_v63  ;;  %v2112_v20 = vld [vmem:[%s2937_s1 + $0x8] ss:$12 sps:$4 sm:$0xff]   ;;  %v2116_v22 = vld [vmem:[%s2937_s1 + $0xe0] ss:$12 sps:$4 sm:$0xff]   ;;  %v2161_v60 = vld [vmem:[%s2937_s1 + $0x278] ss:$12 sps:$4 sm:$0xff]  }
  0x1a   :  { %1447 = vmatprep.mubr.bf16.mxu0 %v2478_v3  ;;  %v2117_v25 = vld [vmem:[%s2937_s1 + $0x20] ss:$12 sps:$4 sm:$0xff]   ;;  %v2132_v37 = vld [vmem:[%s2937_s1 + $0x68] ss:$12 sps:$4 sm:$0xff]  }
  0x1b   :  { %1387 = vmatpush1.bf16.msra.mxu1 %v2052_v26  ;;  %v2120_v26 = vld [vmem:[%s2937_s1 + $0x334] ss:$12 sps:$4 sm:$0xff]   ;;  %v2135_v38 = vld [vmem:[%s2937_s1 + $0x37c] ss:$12 sps:$4 sm:$0xff]  }
  0x1c   :  { %1428 = vmatpush1.bf16.msra.mxu0 %v2053_v27  ;;  %1388 = vmatprep.subr.bf16.mxu1 %v2054_v28  ;;  %v2121_v27 = vld [vmem:[%s2937_s1 + $0xf8] ss:$12 sps:$4 sm:$0xff]   ;;  %v2118_v28 = vld [vmem:[%s2937_s1 + $0x330] ss:$12 sps:$4 sm:$0xff]   ;;  %v2128_v36 = vld [vmem:[%s2937_s1 + $0x360] ss:$12 sps:$4 sm:$0xff]  }
  0x1d   :  { %1429 = vmatprep.subr.bf16.mxu0 %v2056_v29  ;;  %v2122_v29 = vld [vmem:[%s2937_s1 + $0x38] ss:$12 sps:$4 sm:$0xff]   ;;  %v2140_v43 = vld [vmem:[%s2937_s1 + $0x394] ss:$12 sps:$4 sm:$0xff]   ;;  %v2155_v55 = vld [vmem:[%s2937_s1 + $0x3dc] ss:$12 sps:$4 sm:$0xff]  }
  0x1e   :  { %v2143_v49 = vld [vmem:[%s2937_s1 + $0x3a8] ss:$12 sps:$4 sm:$0xff]   ;;  %v2148_v53 = vld [vmem:[%s2937_s1 + $0x3c0] ss:$12 sps:$4 sm:$0xff]  }
  0x1f   :  { %1389 = vmatpush1.bf16.msra.mxu1 %v2058_v30  ;;  %v2125_v30 = vld [vmem:[%s2937_s1 + $0x34c] ss:$12 sps:$4 sm:$0xff]   ;;  %v2160_v59 = vld [vmem:[%s2937_s1 + $0x3f4] ss:$12 sps:$4 sm:$0xff]  }
  0x20   :  { %1430 = vmatpush1.bf16.msra.mxu0 %v2059_v31  ;;  %1390 = vmatprep.subr.bf16.mxu1 %v2060_v32  ;;  %v2126_v31 = vld [vmem:[%s2937_s1 + $0x110] ss:$12 sps:$4 sm:$0xff]   ;;  %v2123_v32 = vld [vmem:[%s2937_s1 + $0x348] ss:$12 sps:$4 sm:$0xff]   ;;  %v2156_v56 = vld [vmem:[%s2937_s1 + $0x260] ss:$12 sps:$4 sm:$0xff]  }
  0x21   :  { %1431 = vmatprep.subr.bf16.mxu0 %v2062_v33  ;;  %v2127_v33 = vld [vmem:[%s2937_s1 + $0x50] ss:$12 sps:$4 sm:$0xff]   ;;  %v2183_v18 = vld [vmem:[%s2937_s1 + $0x468] ss:$12 sps:$4 sm:$0xff]  }
  0x23   :  { %1391 = vmatpush1.bf16.msra.mxu1 %v2064_v34  ;;  %v2130_v34 = vld [vmem:[%s2937_s1 + $0x364] ss:$12 sps:$4 sm:$0xff]  }
  0x24   :  { %1432 = vmatpush1.bf16.msra.mxu0 %v2065_v35  ;;  %1392 = vmatprep.subr.bf16.mxu1 %v2066_v39  ;;  %v2131_v35 = vld [vmem:[%s2937_s1 + $0x128] ss:$12 sps:$4 sm:$0xff]   ;;  %v2136_v39 = vld [vmem:[%s2937_s1 + $0x140] ss:$12 sps:$4 sm:$0xff]  }
  0x25   :  { %1433 = vmatprep.subr.bf16.mxu0 %v2068_v40  ;;  %v2133_v40 = vld [vmem:[%s2937_s1 + $0x378] ss:$12 sps:$4 sm:$0xff]  }
  0x27   :  { %1393 = vmatpush1.bf16.msra.mxu1 %v2070_v41  ;;  %v2137_v41 = vld [vmem:[%s2937_s1 + $0x80] ss:$12 sps:$4 sm:$0xff]  }
  0x28   :  { %1434 = vmatpush1.bf16.msra.mxu0 %v2071_v44  ;;  %1394 = vmatprep.subr.bf16.mxu1 %v2072_v45  ;;  %v2141_v44 = vld [vmem:[%s2937_s1 + $0x158] ss:$12 sps:$4 sm:$0xff]   ;;  %v2138_v45 = vld [vmem:[%s2937_s1 + $0x390] ss:$12 sps:$4 sm:$0xff]  }
  0x29   :  { %1435 = vmatprep.subr.bf16.mxu0 %v2074_v46  ;;  %v2142_v46 = vld [vmem:[%s2937_s1 + $0x98] ss:$12 sps:$4 sm:$0xff]  }
  0x2b   :  { %1395 = vmatpush1.bf16.msra.mxu1 %v2076_v47  ;;  %v2145_v47 = vld [vmem:[%s2937_s1 + $0x3ac] ss:$12 sps:$4 sm:$0xff]  }
  0x2c   :  { %1436 = vmatpush1.bf16.msra.mxu0 %v2077_v48  ;;  %1396 = vmatprep.subr.bf16.mxu1 %v2078_v50  ;;  %v2146_v48 = vld [vmem:[%s2937_s1 + $0x170] ss:$12 sps:$4 sm:$0xff]  }
  0x2d   :  { %1437 = vmatprep.subr.bf16.mxu0 %v2080_v51  ;;  %v2147_v50 = vld [vmem:[%s2937_s1 + $0xb0] ss:$12 sps:$4 sm:$0xff]  }
  0x2e   :  { %v2150_v51 = vld [vmem:[%s2937_s1 + $0x3c4] ss:$12 sps:$4 sm:$0xff]  }
  0x2f   :  { %1397 = vmatpush1.bf16.msra.mxu1 %v2082_v52  ;;  %v2151_v52 = vld [vmem:[%s2937_s1 + $0x248] ss:$12 sps:$4 sm:$0xff]  }
  0x30   :  { %1438 = vmatpush1.bf16.msra.mxu0 %v2083_v54  ;;  %1398 = vmatprep.subr.bf16.mxu1 %v2084_v57  ;;  %v2152_v54 = vld [vmem:[%s2937_s1 + $0x188] ss:$12 sps:$4 sm:$0xff]   ;;  %v2153_v57 = vld [vmem:[%s2937_s1 + $0x3d8] ss:$12 sps:$4 sm:$0xff]  }
  0x31   :  { %1439 = vmatprep.subr.bf16.mxu0 %v2086_v58  ;;  %v2157_v58 = vld [vmem:[%s2937_s1 + $0x1a0] ss:$12 sps:$4 sm:$0xff]  }
  0x33   :  { %1399 = vmatpush1.bf16.msra.mxu1 %v2088_v61  ;;  %v2158_v61 = vld [vmem:[%s2937_s1 + $0x3f0] ss:$12 sps:$4 sm:$0xff]  }
  0x34   :  { %1440 = vmatpush1.bf16.msra.mxu0 %v2089_v62  ;;  %1400 = vmatprep.subr.bf16.mxu1 %v2090_v1  ;;  %v2162_v62 = vld [vmem:[%s2937_s1 + $0x1b8] ss:$12 sps:$4 sm:$0xff]   ;;  %v2166_v1 = vld [vmem:[%s2937_s1 + $0x290] ss:$12 sps:$4 sm:$0xff]  }
  0x35   :  { %1441 = vmatprep.subr.bf16.mxu0 %v2092_v2  ;;  %v2163_v2 = vld [vmem:[%s2937_s1 + $0x408] ss:$12 sps:$4 sm:$0xff]  }
  0x37   :  { %1401 = vmatpush1.bf16.msra.mxu1 %v2094_v4  ;;  %v2170_v4 = vld [vmem:[%s2937_s1 + $0x424] ss:$12 sps:$4 sm:$0xff]  }
  0x38   :  { %1442 = vmatpush1.bf16.msra.mxu0 %v2095_v5  ;;  %1402 = vmatprep.subr.bf16.mxu1 %v2096_v6  ;;  %v2171_v5 = vld [vmem:[%s2937_s1 + $0x2a8] ss:$12 sps:$4 sm:$0xff]   ;;  %v2168_v6 = vld [vmem:[%s2937_s1 + $0x420] ss:$12 sps:$4 sm:$0xff]  }
  0x39   :  { %1443 = vmatprep.subr.bf16.mxu0 %v2098_v7  ;;  %v2172_v7 = vld [vmem:[%s2937_s1 + $0x1e8] ss:$12 sps:$4 sm:$0xff]  }
  0x3b   :  { %1403 = vmatpush1.bf16.msra.mxu1 %v2100_v8  ;;  %v2175_v8 = vld [vmem:[%s2937_s1 + $0x43c] ss:$12 sps:$4 sm:$0xff]  }
  0x3c   :  { %1444 = vmatpush1.bf16.msra.mxu0 %v2101_v9  ;;  %1404 = vmatprep.subr.bf16.mxu1 %v2102_v10  ;;  %v2176_v9 = vld [vmem:[%s2937_s1 + $0x2c0] ss:$12 sps:$4 sm:$0xff]   ;;  %v2173_v10 = vld [vmem:[%s2937_s1 + $0x438] ss:$12 sps:$4 sm:$0xff]  }
  0x3d   :  { %1445 = vmatprep.subr.bf16.mxu0 %v2104_v11  ;;  %v2177_v11 = vld [vmem:[%s2937_s1 + $0x200] ss:$12 sps:$4 sm:$0xff]  }
  0x3f   :  { %1405 = vmatpush1.bf16.msra.mxu1 %v2106_v12  ;;  %v2180_v12 = vld [vmem:[%s2937_s1 + $0x454] ss:$12 sps:$4 sm:$0xff]  }
  0x40   :  { %1446 = vmatpush1.bf16.msra.mxu0 %v2107_v14  ;;  %1911 = vmatprep.subr.bf16.mxu1 %v2111_v16  ;;  %v2178_v14 = vld [vmem:[%s2937_s1 + $0x450] ss:$12 sps:$4 sm:$0xff]   ;;  %v2185_v16 = vld [vmem:[%s2937_s1 + $0x46c] ss:$12 sps:$4 sm:$0xff]  }
  0x41   :  { %1456 = vmatprep.subr.bf16.mxu0 %v2110_v15  ;;  %v2182_v15 = vld [vmem:[%s2937_s1 + $0x218] ss:$12 sps:$4 sm:$0xff]  }
  0x42   :  { %1407 = vmatmul.mubr.bf16.vlgmr.msra.gmra.mrb[0].mxu1 %v2509_v13 }
  0x43   :  { %1448 = vmatmul.mubr.bf16.vlgmr.msra.gmra.mrb[0].mxu0 %v2525_v19  ;;  %1912 = vmatpush3.bf16.msra.mxu1 %v2112_v20  ;;  %v2187_v20 = vld [vmem:[%s2937_s1 + $0x230] ss:$12 sps:$4 sm:$0xff]  }
  0x44   :  { %1457 = vmatpush1.bf16.msra.mxu0 %v2108_v17  ;;  %1913 = vmatprep.subr.bf16.mxu1 %v2116_v22  ;;  %v2186_v17 = vld [vmem:[%s2937_s1 + $0x2f0] ss:$12 sps:$4 sm:$0xff]   ;;  %v2192_v22 = vld [vmem:[%s2937_s1 + $0x3c8] ss:$12 sps:$4 sm:$0xff]  }
  0x45   :  { %1458 = vmatprep.subr.bf16.mxu0 %v2115_v21  ;;  %1570 = vmatprep.mubr.bf16.mxu1 %v330_v63  ;;  %v2165_v63 = vld [vmem:[%s2937_s1 + $0x40c] ss:$12 sps:$4 sm:$0xff]   ;;  %v2191_v21 = vld [vmem:[%s2937_s1 + $0x484] ss:$12 sps:$4 sm:$0xff]  }
  0x46   :  { %1488 = vmatprep.mubr.bf16.mxu0 %v2537_v23 }
  0x47   :  { %1914 = vmatpush3.bf16.msra.mxu1 %v2117_v25  ;;  %v2193_v25 = vld [vmem:[%s2937_s1 + $0x308] ss:$12 sps:$4 sm:$0xff]  }
  0x48   :  { %1459 = vmatpush1.bf16.msra.mxu0 %v2113_v24  ;;  %1915 = vmatprep.subr.bf16.mxu1 %v2121_v27  ;;  %v2189_v24 = vld [vmem:[%s2937_s1 + $0x480] ss:$12 sps:$4 sm:$0xff]  }
  0x49   :  { %1460 = vmatprep.subr.bf16.mxu0 %v2120_v26  ;;  %v2196_v26 = vld [vmem:[%s2937_s1 + $0x49c] ss:$12 sps:$4 sm:$0xff]   ;;  %v2197_v27 = vld [vmem:[%s2937_s1 + $0x3e0] ss:$12 sps:$4 sm:$0xff]  }
  0x4b   :  { %1916 = vmatpush3.bf16.msra.mxu1 %v2122_v29  ;;  %v2741_v29 = vcombine.high %v2537_v23, %v2537_v23 }
  0x4c   :  { %1461 = vmatpush1.bf16.msra.mxu0 %v2118_v28  ;;  %1917 = vmatprep.subr.bf16.mxu1 %v2126_v31  ;;  %v2194_v28 = vld [vmem:[%s2937_s1 + $0x498] ss:$12 sps:$4 sm:$0xff]   ;;  %v2201_v31 = vld [vmem:[%s2937_s1 + $0x4b4] ss:$12 sps:$4 sm:$0xff]  }
  0x4d   :  { %1462 = vmatprep.subr.bf16.mxu0 %v2125_v30  ;;  %v2198_v30 = vld [vmem:[%s2937_s1 + $0x320] ss:$12 sps:$4 sm:$0xff]  }
  0x4f   :  { %1918 = vmatpush3.bf16.msra.mxu1 %v2127_v33  ;;  %v2203_v33 = vld [vmem:[%s2937_s1 + $0x338] ss:$12 sps:$4 sm:$0xff]  }
  0x50   :  { %1463 = vmatpush1.bf16.msra.mxu0 %v2123_v32  ;;  %1919 = vmatprep.subr.bf16.mxu1 %v2131_v35  ;;  %v2202_v32 = vld [vmem:[%s2937_s1 + $0x3f8] ss:$12 sps:$4 sm:$0xff]   ;;  %v2204_v35 = vld [vmem:[%s2937_s1 + $0x4c8] ss:$12 sps:$4 sm:$0xff]  }
  0x51   :  { %1464 = vmatprep.subr.bf16.mxu0 %v2130_v34  ;;  %v2206_v34 = vld [vmem:[%s2937_s1 + $0x4cc] ss:$12 sps:$4 sm:$0xff]  }
  0x53   :  { %1920 = vmatpush3.bf16.msra.mxu1 %v2132_v37  ;;  %v2211_v37 = vld [vmem:[%s2937_s1 + $0x4e4] ss:$12 sps:$4 sm:$0xff]  }
  0x54   :  { %1465 = vmatpush1.bf16.msra.mxu0 %v2128_v36  ;;  %1921 = vmatprep.subr.bf16.mxu1 %v2136_v39  ;;  %v2208_v36 = vld [vmem:[%s2937_s1 + $0x350] ss:$12 sps:$4 sm:$0xff]   ;;  %v2209_v39 = vld [vmem:[%s2937_s1 + $0x4e0] ss:$12 sps:$4 sm:$0xff]  }
  0x55   :  { %1466 = vmatprep.subr.bf16.mxu0 %v2135_v38  ;;  %v2212_v38 = vld [vmem:[%s2937_s1 + $0x428] ss:$12 sps:$4 sm:$0xff]  }
  0x57   :  { %1922 = vmatpush3.bf16.msra.mxu1 %v2137_v41  ;;  %v2216_v41 = vld [vmem:[%s2937_s1 + $0x4fc] ss:$12 sps:$4 sm:$0xff]  }
  0x58   :  { %1467 = vmatpush1.bf16.msra.mxu0 %v2133_v40  ;;  %1923 = vmatprep.subr.bf16.mxu1 %v2141_v44  ;;  %v2213_v40 = vld [vmem:[%s2937_s1 + $0x368] ss:$12 sps:$4 sm:$0xff]   ;;  %v2214_v44 = vld [vmem:[%s2937_s1 + $0x4f8] ss:$12 sps:$4 sm:$0xff]  }
  0x59   :  { %1468 = vmatprep.subr.bf16.mxu0 %v2140_v43  ;;  %v2217_v43 = vld [vmem:[%s2937_s1 + $0x440] ss:$12 sps:$4 sm:$0xff]  }
  0x5b   :  { %1924 = vmatpush3.bf16.msra.mxu1 %v2142_v46  ;;  %v2221_v46 = vld [vmem:[%s2937_s1 + $0x514] ss:$12 sps:$4 sm:$0xff]  }
  0x5c   :  { %1469 = vmatpush1.bf16.msra.mxu0 %v2138_v45  ;;  %1925 = vmatprep.subr.bf16.mxu1 %v2146_v48  ;;  %v2218_v45 = vld [vmem:[%s2937_s1 + $0x380] ss:$12 sps:$4 sm:$0xff]   ;;  %v2219_v48 = vld [vmem:[%s2937_s1 + $0x510] ss:$12 sps:$4 sm:$0xff]  }
  0x5d   :  { %1470 = vmatprep.subr.bf16.mxu0 %v2145_v47  ;;  %v2222_v47 = vld [vmem:[%s2937_s1 + $0x458] ss:$12 sps:$4 sm:$0xff]  }
  0x5f   :  { %1926 = vmatpush3.bf16.msra.mxu1 %v2147_v50  ;;  %v2226_v50 = vld [vmem:[%s2937_s1 + $0x52c] ss:$12 sps:$4 sm:$0xff]  }
  0x60   :  { %1471 = vmatpush1.bf16.msra.mxu0 %v2143_v49  ;;  %1933 = vmatprep.subr.bf16.mxu1 %v2151_v52  ;;  %v2223_v49 = vld [vmem:[%s2937_s1 + $0x398] ss:$12 sps:$4 sm:$0xff]   ;;  %v2224_v52 = vld [vmem:[%s2937_s1 + $0x528] ss:$12 sps:$4 sm:$0xff]  }
  0x61   :  { %1472 = vmatprep.subr.bf16.mxu0 %v2150_v51  ;;  %v2227_v51 = vld [vmem:[%s2937_s1 + $0x470] ss:$12 sps:$4 sm:$0xff]  }
  0x62   :  { %1571 = vmatmul.mubr.bf16.vlgmr.msra.gmra.mrb[4].mxu1 %v2509_v13  ;;  %v2181_v13 = vld [vmem:[%s2937_s1 + $0x2d8] ss:$12 sps:$4 sm:$0xff]  }
  0x63   :  { %1934 = vmatpush3.bf16.msra.mxu1 %v2152_v54  ;;  %1610 = vmatprep.mubr.bf16.mxu1 %v2478_v3  ;;  %v2167_v3 = vld [vmem:[%s2937_s1 + $0x1d0] ss:$12 sps:$4 sm:$0xff]  }
  0x64   :  { %1473 = vmatpush1.bf16.msra.mxu0 %v2148_v53  ;;  %1935 = vmatprep.subr.bf16.mxu1 %v2156_v56  ;;  %v2228_v53 = vld [vmem:[%s2937_s1 + $0x3b0] ss:$12 sps:$4 sm:$0xff]   ;;  %v2229_v56 = vld [vmem:[%s2937_s1 + $0x540] ss:$12 sps:$4 sm:$0xff]  }
  0x65   :  { %1474 = vmatprep.subr.bf16.mxu0 %v2155_v55  ;;  %v2231_v54 = vld [vmem:[%s2937_s1 + $0x544] ss:$12 sps:$4 sm:$0xff]   ;;  %v2232_v55 = vld [vmem:[%s2937_s1 + $0x548] ss:$12 sps:$4 sm:$0xff]  }
  0x67   :  { %1936 = vmatpush3.bf16.msra.mxu1 %v2157_v58  ;;  %v2236_v58 = vld [vmem:[%s2937_s1 + $0x55c] ss:$12 sps:$4 sm:$0xff]  }
  0x68   :  { %1475 = vmatpush1.bf16.msra.mxu0 %v2153_v57  ;;  %1937 = vmatprep.subr.bf16.mxu1 %v2161_v60  ;;  %v2233_v57 = vld [vmem:[%s2937_s1 + $0x488] ss:$12 sps:$4 sm:$0xff]   ;;  %v2234_v60 = vld [vmem:[%s2937_s1 + $0x558] ss:$12 sps:$4 sm:$0xff]  }
  0x69   :  { %1476 = vmatprep.subr.bf16.mxu0 %v2160_v59  ;;  %v2237_v59 = vld [vmem:[%s2937_s1 + $0x560] ss:$12 sps:$4 sm:$0xff]  }
  0x6b   :  { %1938 = vmatpush3.bf16.msra.mxu1 %v2162_v62  ;;  %v2241_v62 = vld [vmem:[%s2937_s1 + $0x574] ss:$12 sps:$4 sm:$0xff]  }
  0x6c   :  { %1477 = vmatpush1.bf16.msra.mxu0 %v2158_v61  ;;  %1939 = vmatprep.subr.bf16.mxu1 %v2166_v1  ;;  %v2238_v61 = vld [vmem:[%s2937_s1 + $0x4a0] ss:$12 sps:$4 sm:$0xff]   ;;  %v2239_v1 = vld [vmem:[%s2937_s1 + $0x570] ss:$12 sps:$4 sm:$0xff]  }
  0x6d   :  { %1478 = vmatprep.subr.bf16.mxu0 %v2165_v63  ;;  %v2242_v63 = vld [vmem:[%s2937_s1 + $0x578] ss:$12 sps:$4 sm:$0xff]  }
  0x6f   :  { %1940 = vmatpush3.bf16.msra.mxu1 %v2167_v3  ;;  %v2246_v3 = vld [vmem:[%s2937_s1 + $0x58c] ss:$12 sps:$4 sm:$0xff]  }
  0x70   :  { %1479 = vmatpush1.bf16.msra.mxu0 %v2163_v2  ;;  %1941 = vmatprep.subr.bf16.mxu1 %v2171_v5  ;;  %v2243_v2 = vld [vmem:[%s2937_s1 + $0x4b8] ss:$12 sps:$4 sm:$0xff]   ;;  %v2244_v5 = vld [vmem:[%s2937_s1 + $0x588] ss:$12 sps:$4 sm:$0xff]  }
  0x71   :  { %1480 = vmatprep.subr.bf16.mxu0 %v2170_v4  ;;  %v2247_v4 = vld [vmem:[%s2937_s1 + $0x590] ss:$12 sps:$4 sm:$0xff]  }
  0x73   :  { %1942 = vmatpush3.bf16.msra.mxu1 %v2172_v7  ;;  %v2251_v7 = vld [vmem:[%s2937_s1 + $0x5a4] ss:$12 sps:$4 sm:$0xff]  }
  0x74   :  { %1481 = vmatpush1.bf16.msra.mxu0 %v2168_v6  ;;  %1943 = vmatprep.subr.bf16.mxu1 %v2176_v9  ;;  %v2248_v6 = vld [vmem:[%s2937_s1 + $0x4d0] ss:$12 sps:$4 sm:$0xff]   ;;  %v2249_v9 = vld [vmem:[%s2937_s1 + $0x5a0] ss:$12 sps:$4 sm:$0xff]  }
  0x75   :  { %1482 = vmatprep.subr.bf16.mxu0 %v2175_v8  ;;  %v2252_v8 = vld [vmem:[%s2937_s1 + $0x5a8] ss:$12 sps:$4 sm:$0xff]  }
  0x77   :  { %1944 = vmatpush3.bf16.msra.mxu1 %v2177_v11  ;;  %v2256_v11 = vld [vmem:[%s2937_s1 + $0x5bc] ss:$12 sps:$4 sm:$0xff]  }
  0x78   :  { %1483 = vmatpush1.bf16.msra.mxu0 %v2173_v10  ;;  %1945 = vmatprep.subr.bf16.mxu1 %v2181_v13  ;;  %v2253_v10 = vld [vmem:[%s2937_s1 + $0x4e8] ss:$12 sps:$4 sm:$0xff]   ;;  %v2254_v13 = vld [vmem:[%s2937_s1 + $0x5b8] ss:$12 sps:$4 sm:$0xff]  }
  0x79   :  { %1484 = vmatprep.subr.bf16.mxu0 %v2180_v12  ;;  %v2257_v12 = vld [vmem:[%s2937_s1 + $0x5c0] ss:$12 sps:$4 sm:$0xff]  }
  0x7b   :  { %1946 = vmatpush3.bf16.msra.mxu1 %v2182_v15  ;;  %v2261_v15 = vld [vmem:[%s2937_s1 + $0x5d4] ss:$12 sps:$4 sm:$0xff]  }
  0x7c   :  { %1485 = vmatpush1.bf16.msra.mxu0 %v2178_v14  ;;  %1947 = vmatprep.subr.bf16.mxu1 %v2186_v17  ;;  %v2258_v14 = vld [vmem:[%s2937_s1 + $0x500] ss:$12 sps:$4 sm:$0xff]   ;;  %v2259_v17 = vld [vmem:[%s2937_s1 + $0x5d0] ss:$12 sps:$4 sm:$0xff]  }
  0x7d   :  { %1486 = vmatprep.subr.bf16.mxu0 %v2185_v16  ;;  %v2262_v16 = vld [vmem:[%s2937_s1 + $0x5d8] ss:$12 sps:$4 sm:$0xff]  }
  0x7f   :  { %1948 = vmatpush3.bf16.msra.mxu1 %v2187_v20  ;;  %v2266_v20 = vld [vmem:[%s2937_s1 + $0x5ec] ss:$12 sps:$4 sm:$0xff]  }
  0x80   :  { %1487 = vmatpush1.bf16.msra.mxu0 %v2183_v18  ;;  %1955 = vmatprep.subr.bf16.mxu1 %v2192_v22  ;;  %v2263_v18 = vld [vmem:[%s2937_s1 + $0x518] ss:$12 sps:$4 sm:$0xff]   ;;  %v2264_v22 = vld [vmem:[%s2937_s1 + $0x5e8] ss:$12 sps:$4 sm:$0xff]  }
  0x81   :  { %1497 = vmatprep.subr.bf16.mxu0 %v2191_v21  ;;  %v2267_v21 = vld [vmem:[%s2937_s1 + $0x5f0] ss:$12 sps:$4 sm:$0xff]  }
  0x82   :  { %1611 = vmatmul.mubr.bf16.vlgmr.msra.gmra.mrb[8].mxu1 %v2525_v19  ;;  %v2199_v19 = vld [vmem:[%s2937_s1 + $0x4b0] ss:$12 sps:$4 sm:$0xff]  }
  0x83   :  { %1489 = vmatmul.mubr.bf16.vlgmr.msra.gmra.mrb[0].mxu0 %v2470_v0  ;;  %1956 = vmatpush3.bf16.msra.mxu1 %v2193_v25  ;;  %v339_v25 = vcombine.high %v2470_v0, %v2470_v0 }
  0x84   :  { %1498 = vmatpush1.bf16.msra.mxu0 %v2189_v24  ;;  %1957 = vmatprep.subr.bf16.mxu1 %v2197_v27  ;;  %v2268_v24 = vld [vmem:[%s2937_s1 + $0x530] ss:$12 sps:$4 sm:$0xff]  }
  0x85   :  { %1499 = vmatprep.subr.bf16.mxu0 %v2196_v26  ;;  %1650 = vmatprep.mubr.bf16.mxu1 %v2537_v23  ;;  %v2207_v23 = vld [vmem:[%s2937_s1 + $0x410] ss:$12 sps:$4 sm:$0xff]  }
  0x86   :  { %1529 = vmatprep.mubr.bf16.mxu0 %v2741_v29 }
  0x87   :  { %1958 = vmatpush3.bf16.msra.mxu1 %v2198_v30 }
  0x88   :  { %1500 = vmatpush1.bf16.msra.mxu0 %v2194_v28  ;;  %1959 = vmatprep.subr.bf16.mxu1 %v2202_v32 }
  0x89   :  { %1501 = vmatprep.subr.bf16.mxu0 %v2201_v31 }
  0x8b   :  { %1960 = vmatpush3.bf16.msra.mxu1 %v2203_v33 }
  0x8c   :  { %1502 = vmatpush1.bf16.msra.mxu0 %v2199_v19  ;;  %1961 = vmatprep.subr.bf16.mxu1 %v2207_v23  ;;  %v275_v23 = vld [vmem:[%s2939_s2] sm:$0x7] }
  0x8d   :  { %1503 = vmatprep.subr.bf16.mxu0 %v2206_v34  ;;  %v287_v34 = vsub.s32 2, %v2419_v42 }
  0x8f   :  { %1962 = vmatpush3.bf16.msra.mxu1 %v2208_v36 }
  0x90   :  { %1504 = vmatpush1.bf16.msra.mxu0 %v2204_v35  ;;  %1963 = vmatprep.subr.bf16.mxu1 %v2212_v38 }
  0x91   :  { %1505 = vmatprep.subr.bf16.mxu0 %v2211_v37 }
  0x93   :  { %1964 = vmatpush3.bf16.msra.mxu1 %v2213_v40 }
  0x94   :  { %1506 = vmatpush1.bf16.msra.mxu0 %v2209_v39  ;;  %1965 = vmatprep.subr.bf16.mxu1 %v2217_v43 }
  0x95   :  { %1507 = vmatprep.subr.bf16.mxu0 %v2216_v41 }
  0x97   :  { %1966 = vmatpush3.bf16.msra.mxu1 %v2218_v45 }
  0x98   :  { %1508 = vmatpush1.bf16.msra.mxu0 %v2214_v44  ;;  %1967 = vmatprep.subr.bf16.mxu1 %v2222_v47 }
  0x99   :  { %1509 = vmatprep.subr.bf16.mxu0 %v2221_v46 }
  0x9b   :  { %1968 = vmatpush3.bf16.msra.mxu1 %v2223_v49  ;;  %v279_v49 = vsub.s32 0, %v2419_v42 }
  0x9c   :  { %1510 = vmatpush1.bf16.msra.mxu0 %v2219_v48  ;;  %1969 = vmatprep.subr.bf16.mxu1 %v2227_v51 }
  0x9d   :  { %1511 = vmatprep.subr.bf16.mxu0 %v2226_v50  ;;  %v283_v50 = vsub.s32 1, %v2419_v42  ;;  %v280_v51 = vrot.slane %v275_v23, %v279_v49 }
  0x9f   :  { %1970 = vmatpush3.bf16.msra.mxu1 %v2228_v53 }
  0xa0   :  { %1512 = vmatpush1.bf16.msra.mxu0 %v2224_v52  ;;  %1977 = vmatprep.subr.bf16.mxu1 %v2232_v55  ;;  %v284_v52 = vrot.slane %v275_v23, %v283_v50 }
  0xa1   :  { %1513 = vmatprep.subr.bf16.mxu0 %v2231_v54 }
  0xa2   :  { %1651 = vmatmul.mubr.bf16.vlgmr.msra.gmra.mrb[12].mxu1 %v2470_v0  ;;  %v288_v0 = vrot.slane %v275_v23, %v287_v34 }
  0xa3   :  { %1978 = vmatpush3.bf16.msra.mxu1 %v2233_v57  ;;  %1690 = vmatprep.mubr.bf16.mxu1 %v2741_v29 }
  0xa4   :  { %1514 = vmatpush1.bf16.msra.mxu0 %v2229_v56  ;;  %1979 = vmatprep.subr.bf16.mxu1 %v2237_v59 }
  0xa5   :  { %1515 = vmatprep.subr.bf16.mxu0 %v2236_v58 }
  0xa7   :  { %1980 = vmatpush3.bf16.msra.mxu1 %v2238_v61 }
  0xa8   :  { %1516 = vmatpush1.bf16.msra.mxu0 %v2234_v60  ;;  %1981 = vmatprep.subr.bf16.mxu1 %v2242_v63 }
  0xa9   :  { %1517 = vmatprep.subr.bf16.mxu0 %v2241_v62 }
  0xab   :  { %1982 = vmatpush3.bf16.msra.mxu1 %v2243_v2 }
  0xac   :  { %1518 = vmatpush1.bf16.msra.mxu0 %v2239_v1  ;;  %1983 = vmatprep.subr.bf16.mxu1 %v2247_v4 }
  0xad   :  { %1519 = vmatprep.subr.bf16.mxu0 %v2246_v3 }
  0xaf   :  { %1984 = vmatpush3.bf16.msra.mxu1 %v2248_v6 }
  0xb0   :  { %1520 = vmatpush1.bf16.msra.mxu0 %v2244_v5  ;;  %1985 = vmatprep.subr.bf16.mxu1 %v2252_v8 }
  0xb1   :  { %1521 = vmatprep.subr.bf16.mxu0 %v2251_v7 }
  0xb3   :  { %1986 = vmatpush3.bf16.msra.mxu1 %v2253_v10 }
  0xb4   :  { %1522 = vmatpush1.bf16.msra.mxu0 %v2249_v9  ;;  %1987 = vmatprep.subr.bf16.mxu1 %v2257_v12 }
  0xb5   :  { %1523 = vmatprep.subr.bf16.mxu0 %v2256_v11 }
  0xb7   :  { %1988 = vmatpush3.bf16.msra.mxu1 %v2258_v14 }
  0xb8   :  { %1524 = vmatpush1.bf16.msra.mxu0 %v2254_v13  ;;  %1989 = vmatprep.subr.bf16.mxu1 %v2262_v16 }
  0xb9   :  { %1525 = vmatprep.subr.bf16.mxu0 %v2261_v15 }
  0xbb   :  { %1990 = vmatpush3.bf16.msra.mxu1 %v2263_v18 }
  0xbc   :  { %1526 = vmatpush1.bf16.msra.mxu0 %v2259_v17  ;;  %1991 = vmatprep.subr.bf16.mxu1 %v2267_v21 }
  0xbd   :  { %1527 = vmatprep.subr.bf16.mxu0 %v2266_v20 }
  0xbf   :  { %1992 = vmatpush3.bf16.msra.mxu1 %v2268_v24 }
  0xc0   :  { %1528 = vmatpush1.bf16.msra.mxu0 %v2264_v22 }
  0xc2   :  { %1691 = vmatmul.mubr.bf16.vlgmr.msra.gmra.mrb[16].mxu1 %v339_v25 }
  0xc3   :  { %1530 = vmatmul.mubr.bf16.vlgmr.msra.gmra.mrb[0].mxu0 %v339_v25 }
 0x115   :  { %v1408_v26 = vpop.f32.mrb[0].mxu1 }
 0x116   :  { %v1410_v27 = vpop.f32.mrb[1].mxu1  ;;  %v1409_v53 = vadd.f32 %v1408_v26, %v280_v51 }
 0x117   :  { %v1412_v28 = vpop.f32.mrb[2].mxu1  ;;  %v1411_v54 = vadd.f32 %v1410_v27, %v284_v52 }
 0x118   :  { %v1413_v29 = vpop.f32.mrb[3].mxu1 }
 0x135   :  { %v1927_v30 = vpop.f32.mrb[4].mxu1 }
 0x136   :  { %v1928_v31 = vpop.f32.mrb[5].mxu1 }
 0x137   :  { %v1929_v32 = vadd.f32 %v1928_v31, %v1927_v30  ;;  %v1930_v19 = vpop.f32.mrb[6].mxu1 }
 0x138   :  { %v1931_v33 = vpop.f32.mrb[7].mxu1 }
 0x139   :  { %v1573_v37 = vadd.f32 %v1929_v32, %v288_v0 }
 0x155   :  { %v1949_v35 = vpop.f32.mrb[8].mxu1 }
 0x156   :  { %v1950_v36 = vpop.f32.mrb[9].mxu1 }
 0x157   :  { %v1951_v38 = vadd.f32 %v1950_v36, %v1949_v35  ;;  %v1952_v39 = vpop.f32.mrb[10].mxu1 }
 0x158   :  { %v1953_v40 = vpop.f32.mrb[11].mxu1 }
 0x159   :  { %v1613_v41 = vadd.f32 %v1951_v38, %v1573_v37 }
 0x175   :  { %v1971_v43 = vpop.f32.mrb[12].mxu1 }
 0x176   :  { %v1972_v44 = vpop.f32.mrb[13].mxu1 }
 0x177   :  { %v1973_v45 = vadd.f32 %v1972_v44, %v1971_v43  ;;  %v1974_v46 = vpop.f32.mrb[14].mxu1 }
 0x178   :  { %v1975_v47 = vpop.f32.mrb[15].mxu1 }
 0x179   :  { %v1653_v48 = vadd.f32 %v1973_v45, %v1613_v41 }
 0x195   :  { %v1993_v56 = vpop.f32.mrb[16].mxu1 }
 0x196   :  { %v1531_v55 = vpop.f32.mrb[0].mxu0  ;;  %v1994_v59 = vpop.f32.mrb[17].mxu1 }
 0x197   :  { %v2000_v57 = vadd.f32 %v1531_v55, %v1409_v53  ;;  %v1533_v58 = vpop.f32.mrb[1].mxu0  ;;  %v1995_v61 = vadd.f32 %v1994_v59, %v1993_v56  ;;  %v1996_v63 = vpop.f32.mrb[18].mxu1 }
 0x198   :  { %v2002_v60 = vadd.f32 %v1533_v58, %v1411_v54  ;;  %v1535_v62 = vpop.f32.mrb[2].mxu0  ;;  %v1997_v2 = vpop.f32.mrb[19].mxu1 }
 0x199   :  { %1698 = vst [vmem:[%s2940_s3] sm:$0x3] %v2000_v57  ;;  %v1536_v1 = vpop.f32.mrb[3].mxu0  ;;  %v1693_v3 = vadd.f32 %v1995_v61, %v1653_v48 }
 0x19a   :  { %v1701_v42 = vmul.f32 1.442695, %v2002_v60  ;;  %v1700_v5 = vadd.f32 1.0, %v2002_v60  ;;  %vm1699_vm0 = vcmp.gt.f32.partialorder %v2002_v60, 0.0 }
 0x19b   :  { %1706 = vst [vmem:[%s2941_s5] sm:$0x3] %v1693_v3 }
 0x19c   :  { %2269 = vpow2.f32 %v1701_v42 }
 0x1a6   :  { %v2270_v4 = vpop.eup %2269 }
 0x1a7   :  { %v1703_v6 = vadd.f32 1e-15, %v2270_v4 }
 0x1a9   :  { %v1704_v7 = vsel %vm1699_vm0, %v1700_v5, %v1703_v6 }
 0x1aa   :  { %1705 = vst [vmem:[%s2942_s4] sm:$0x3] %v1704_v7 }

</bundles_post_ra>
